<compile_context>
chip_gen: v7x
topology: tpu7x:2x2x1
jax: 0.10.0
libtpu: 0.0.40
codegen_flags: <defaults>
</compile_context>

<pallas_src>
import math

import jax
import jax.numpy as jnp
from jax import lax
from jax.experimental import pallas as pl
from jax.experimental.pallas import tpu as pltpu


def _mha_kernel(xq_ref, xkv_ref, wq_ref, wk_ref, wv_ref, wo_ref,
                bq_ref, bk_ref, bv_ref, bo_ref,
                o_ref,
                q_s, m_s, l_s, acc_s, out_acc):
    """One grid step = (batch b, query tile qt, head h, kv tile kt)."""
    h = pl.program_id(2)
    kt = pl.program_id(3)
    last_h = pl.num_programs(2) - 1
    last_kt = pl.num_programs(3) - 1

    # ---- init the per-(b, qt) output accumulator (revisited over h and kt) ----
    @pl.when(jnp.logical_and(h == 0, kt == 0))
    def _():
        out_acc[...] = jnp.zeros_like(out_acc)

    # ---- per-(b, qt, h) init: q projection once + online-softmax state -------
    @pl.when(kt == 0)
    def _():
        # 1/sqrt(hd) is already folded into wq/bq by the wrapper.
        q_s[...] = (jnp.dot(xq_ref[0], wq_ref[0],
                            preferred_element_type=jnp.float32) + bq_ref[0])
        m_s[...] = jnp.full_like(m_s, -jnp.inf)
        l_s[...] = jnp.zeros_like(l_s)
        acc_s[...] = jnp.zeros_like(acc_s)

    # ---- K/V projection for this head / kv tile (2-D MXU matmuls) ------------
    k = jnp.dot(xkv_ref[0], wk_ref[0],
                preferred_element_type=jnp.float32) + bk_ref[0]      # (TK, hd)
    v = jnp.dot(xkv_ref[0], wv_ref[0],
                preferred_element_type=jnp.float32) + bv_ref[0]      # (TK, hd)

    # ---- online softmax update (flash attention) ------------------------------
    # q @ k.T expressed as dot_general contracting the hd dims -> no explicit
    # transpose of k is materialized.
    logits = lax.dot_general(q_s[...], k, (((1,), (1,)), ((), ())),
                             preferred_element_type=jnp.float32)     # (TQ, TK)
    m_new = jnp.maximum(m_s[...], jnp.max(logits, axis=-1, keepdims=True))
    alpha = jnp.exp(m_s[...] - m_new)
    p = jnp.exp(logits - m_new)
    l_s[...] = alpha * l_s[...] + jnp.sum(p, axis=-1, keepdims=True)
    acc_s[...] = alpha * acc_s[...] + jnp.dot(p, v,
                                              preferred_element_type=jnp.float32)
    m_s[...] = m_new

    # ---- finalize this head: normalize the (TQ, hd) context once and fold the
    # ---- output projection for this head into the accumulator -----------------
    @pl.when(kt == last_kt)
    def _():
        # approx=True would move this to the (idle) EUP slot; kept exact so the
        # strict reference tolerance holds.
        ctx = acc_s[...] * pl.reciprocal(l_s[...], approx=False)     # (TQ, hd)
        out_acc[...] += jnp.dot(ctx, wo_ref[0],
                                preferred_element_type=jnp.float32)

    # ---- write the output tile once, after the last head / last kv tile -------
    @pl.when(jnp.logical_and(h == last_h, kt == last_kt))
    def _():
        o_ref[0] = (out_acc[...] + bo_ref[...]).astype(o_ref.dtype)


def _pick_tile(s, target):
    """Largest multiple-of-8 divisor of s that is <= target (or s itself)."""
    if s <= target:
        return s
    for t in range(target, 7, -1):
        if s % t == 0 and t % 8 == 0:
            return t
    return s


def multihead_attention_pallas(x, wqkv, bqkv, wo, bo, num_head,
                               *, q_tile=256, kv_tile=256,
                               vmem_limit_bytes=64 * 1024 * 1024):
    """x: (B, S, in_dim); wqkv: (3*out_dim, in_dim); wo: (out_dim, out_dim)."""
    B, S, in_dim = x.shape
    out_dim = wo.shape[0]
    assert out_dim % num_head == 0, "out_dim must be divisible by num_head"
    hd = out_dim // num_head
    scale = 1.0 / math.sqrt(hd)

    # ---- one-time weight relayout (outside the kernel, free) ------------------
    # wqkv rows are per-head interleaved [q_h | k_h | v_h]; regroup into
    # per-head (in_dim, hd) blocks so head selection happens via BlockSpecs.
    w3 = wqkv.reshape(num_head, 3, hd, in_dim)
    wq = jnp.swapaxes(w3[:, 0], 1, 2) * scale         # (H, in_dim, hd), scaled
    wk = jnp.swapaxes(w3[:, 1], 1, 2)                 # (H, in_dim, hd)
    wv = jnp.swapaxes(w3[:, 2], 1, 2)                 # (H, in_dim, hd)
    b3 = bqkv.reshape(num_head, 3, 1, hd)
    bq = b3[:, 0] * scale                             # (H, 1, hd), scaled
    bk = b3[:, 1]
    bv = b3[:, 2]
    wo_h = wo.T.reshape(num_head, hd, out_dim)        # (H, hd, out_dim)
    bo2 = bo.reshape(1, out_dim)

    TQ = _pick_tile(S, q_tile)
    TK = _pick_tile(S, kv_tile)
    grid = (B, S // TQ, num_head, S // TK)

    def head_map(b, qt, h, kt):
        return (h, 0, 0)

    return pl.pallas_call(
        _mha_kernel,
        out_shape=jax.ShapeDtypeStruct((B, S, out_dim), x.dtype),
        grid_spec=pltpu.PrefetchScalarGridSpec(
            num_scalar_prefetch=0,
            grid=grid,
            in_specs=[
                pl.BlockSpec((1, TQ, in_dim), lambda b, qt, h, kt: (b, qt, 0)),  # x (q rows)
                pl.BlockSpec((1, TK, in_dim), lambda b, qt, h, kt: (b, kt, 0)),  # x (kv rows)
                pl.BlockSpec((1, in_dim, hd), head_map),                         # wq (scaled)
                pl.BlockSpec((1, in_dim, hd), head_map),                         # wk
                pl.BlockSpec((1, in_dim, hd), head_map),                         # wv
                pl.BlockSpec((1, hd, out_dim), head_map),                        # wo (per head)
                pl.BlockSpec((1, 1, hd), head_map),                              # bq (scaled)
                pl.BlockSpec((1, 1, hd), head_map),                              # bk
                pl.BlockSpec((1, 1, hd), head_map),                              # bv
                pl.BlockSpec((1, out_dim), lambda b, qt, h, kt: (0, 0)),         # bo
            ],
            out_specs=pl.BlockSpec((1, TQ, out_dim),
                                   lambda b, qt, h, kt: (b, qt, 0)),
            scratch_shapes=[
                pltpu.VMEM((TQ, hd), jnp.float32),        # q for current (qt, h)
                pltpu.VMEM((TQ, 1), jnp.float32),         # running max
                pltpu.VMEM((TQ, 1), jnp.float32),         # running denom
                pltpu.VMEM((TQ, hd), jnp.float32),        # running context
                pltpu.VMEM((TQ, out_dim), jnp.float32),   # output accumulator
            ],
        ),
        compiler_params=pltpu.CompilerParams(
            dimension_semantics=("parallel", "parallel", "arbitrary", "arbitrary"),
            vmem_limit_bytes=vmem_limit_bytes,
        ),
    )(x, x, wq, wk, wv, wo_h, bq, bk, bv, bo2)


def _xavier_uniform(key, shape, dtype=jnp.float32):
    # PyTorch nn.init.xavier_uniform_ for a Linear weight (out_features, in_features)
    fan_out, fan_in = shape
    bound = math.sqrt(6.0 / (fan_in + fan_out))
    return jax.random.uniform(key, shape, dtype, minval=-bound, maxval=bound)


def _reference(x, wqkv, bqkv, wo, bo, num_head):
    # Pure-JAX replica of the PyTorch forward (mask=None).
    B, S, _ = x.shape
    out_dim = wo.shape[0]
    hd = out_dim // num_head
    qkv = x @ wqkv.T + bqkv                               # (B, S, 3*out_dim)
    qkv = qkv.reshape(B, S, num_head, 3 * hd).transpose(0, 2, 1, 3)
    q, k, v = jnp.split(qkv, 3, axis=-1)
    logits = (q @ jnp.swapaxes(k, -2, -1)) / math.sqrt(hd)
    attn = jax.nn.softmax(logits, axis=-1)
    new_v = attn @ v                                      # (B, H, S, hd)
    new_v = new_v.transpose(0, 2, 1, 3).reshape(B, S, out_dim)
    return new_v @ wo.T + bo


if __name__ == "__main__":
    B, S = 2, 8
    in_dim, out_dim, num_head = 32, 32, 4

    key = jax.random.PRNGKey(0)
    kx, kq, ko, kbq, kbo = jax.random.split(key, 5)

    x = jax.random.normal(kx, (B, S, in_dim), dtype=jnp.float32)

    # Weights mirror _reset_parameters(); biases made nonzero here to exercise
    # the full bias plumbing (the module supports arbitrary biases via same_as_gt).
    wqkv = _xavier_uniform(kq, (3 * out_dim, in_dim))
    wo = _xavier_uniform(ko, (out_dim, out_dim))
    bqkv = 0.1 * jax.random.normal(kbq, (3 * out_dim,), dtype=jnp.float32)
    bo = 0.1 * jax.random.normal(kbo, (out_dim,), dtype=jnp.float32)

    out = multihead_attention_pallas(x, wqkv, bqkv, wo, bo, num_head)
    out = jax.block_until_ready(out)

    ref = _reference(x, wqkv, bqkv, wo, bo, num_head)
    assert out.shape == (B, S, out_dim)
    max_err = jnp.max(jnp.abs(out - ref))
    assert jnp.allclose(out, ref, atol=1e-4, rtol=1e-4), (
        f"mismatch vs reference: max |diff| = {max_err}")

    print("KERNEL_OK")
</pallas_src>

<mosaic_0001>
module attributes {stable_mosaic.version = 11 : i64} {
  func.func @_mha_kernel(%arg0: i32, %arg1: i32, %arg2: i32, %arg3: i32, %arg4: memref<1x8x32xf32, #tpu.memory_space<vmem>>, %arg5: memref<1x8x32xf32, #tpu.memory_space<vmem>>, %arg6: memref<1x32x8xf32, #tpu.memory_space<vmem>>, %arg7: memref<1x32x8xf32, #tpu.memory_space<vmem>>, %arg8: memref<1x32x8xf32, #tpu.memory_space<vmem>>, %arg9: memref<1x8x32xf32, #tpu.memory_space<vmem>>, %arg10: memref<1x1x8xf32, #tpu.memory_space<vmem>>, %arg11: memref<1x1x8xf32, #tpu.memory_space<vmem>>, %arg12: memref<1x1x8xf32, #tpu.memory_space<vmem>>, %arg13: memref<1x32xf32, #tpu.memory_space<vmem>>, %arg14: memref<1x8x32xf32, #tpu.memory_space<vmem>>, %arg15: memref<8x8xf32, #tpu.memory_space<vmem>>, %arg16: memref<8x1xf32, #tpu.memory_space<vmem>>, %arg17: memref<8x1xf32, #tpu.memory_space<vmem>>, %arg18: memref<8x8xf32, #tpu.memory_space<vmem>>, %arg19: memref<8x32xf32, #tpu.memory_space<vmem>>) attributes {dimension_semantics = [#tpu.dimension_semantics<parallel>, #tpu.dimension_semantics<parallel>, #tpu.dimension_semantics<arbitrary>, #tpu.dimension_semantics<arbitrary>], iteration_bounds = array<i64: 2, 1, 4, 1>, scalar_prefetch = 0 : i64, scratch_operands = 5 : i64, tpu.core_type = #tpu.core_type<tc>, window_params = [{transform_indices = @transform_0, window_bounds = array<i64: 1, 8, 32>}, {transform_indices = @transform_1, window_bounds = array<i64: 1, 8, 32>}, {transform_indices = @transform_2, window_bounds = array<i64: 1, 32, 8>}, {transform_indices = @transform_3, window_bounds = array<i64: 1, 32, 8>}, {transform_indices = @transform_4, window_bounds = array<i64: 1, 32, 8>}, {transform_indices = @transform_5, window_bounds = array<i64: 1, 8, 32>}, {transform_indices = @transform_6, window_bounds = array<i64: 1, 1, 8>}, {transform_indices = @transform_7, window_bounds = array<i64: 1, 1, 8>}, {transform_indices = @transform_8, window_bounds = array<i64: 1, 1, 8>}, {pipeline_mode = #tpu.pipeline_mode<synchronous>, transform_indices = @transform_9, window_bounds = array<i64: 1, 32>}, {transform_indices = @transform_10, window_bounds = array<i64: 1, 8, 32>}]} {
    %c0_i32 = arith.constant 0 : i32
    %0 = arith.cmpi eq, %arg2, %c0_i32 : i32
    %c0_i32_0 = arith.constant 0 : i32
    %1 = arith.cmpi eq, %arg3, %c0_i32_0 : i32
    %2 = arith.andi %0, %1 : i1
    %3 = arith.extui %2 : i1 to i32
    %c0_i32_1 = arith.constant 0 : i32
    %4 = arith.cmpi ne, %3, %c0_i32_1 : i32
    scf.if %4 {
      %cst_46 = arith.constant 0.000000e+00 : f32
      %59 = vector.broadcast %cst_46 : f32 to vector<8x32xf32>
      %c0_47 = arith.constant 0 : index
      %c0_48 = arith.constant 0 : index
      %60 = vector.load %arg19[%c0_47, %c0_48] : memref<8x32xf32, #tpu.memory_space<vmem>>, vector<8x32xf32>
      tpu.vector_store %arg19[%c0_47, %c0_48], %59 {strides = array<i32>} : memref<8x32xf32, #tpu.memory_space<vmem>>, vector<8x32xf32>,
    } else {
    }
    %c0_i32_2 = arith.constant 0 : i32
    %5 = arith.cmpi eq, %arg3, %c0_i32_2 : i32
    %6 = arith.extui %5 : i1 to i32
    %c0_i32_3 = arith.constant 0 : i32
    %7 = arith.cmpi ne, %6, %c0_i32_3 : i32
    scf.if %7 {
      %c0_46 = arith.constant 0 : index
      %c0_47 = arith.constant 0 : index
      %c0_48 = arith.constant 0 : index
      %59 = vector.load %arg4[%c0_46, %c0_47, %c0_48] : memref<1x8x32xf32, #tpu.memory_space<vmem>>, vector<1x8x32xf32>
      %60 = vector.shape_cast %59 : vector<1x8x32xf32> to vector<8x32xf32>
      %c0_49 = arith.constant 0 : index
      %c0_50 = arith.constant 0 : index
      %c0_51 = arith.constant 0 : index
      %61 = vector.load %arg6[%c0_49, %c0_50, %c0_51] : memref<1x32x8xf32, #tpu.memory_space<vmem>>, vector<1x32x8xf32>
      %62 = vector.shape_cast %61 : vector<1x32x8xf32> to vector<32x8xf32>
      %cst_52 = arith.constant dense<0.000000e+00> : vector<8x8xf32>
      %63 = tpu.matmul %60, %62, %cst_52 {dimension_numbers = #tpu.dot_dimension_numbers<[1], [0], [0], [1], [0, 0, 1, 1], [], []>} : vector<8x32xf32>, vector<32x8xf32>, vector<8x8xf32> -> vector<8x8xf32>
      %c0_53 = arith.constant 0 : index
      %c0_54 = arith.constant 0 : index
      %c0_55 = arith.constant 0 : index
      %64 = vector.load %arg10[%c0_53, %c0_54, %c0_55] : memref<1x1x8xf32, #tpu.memory_space<vmem>>, vector<1x1x8xf32>
      %65 = vector.shape_cast %64 : vector<1x1x8xf32> to vector<1x8xf32>
      %66 = vector.broadcast %65 : vector<1x8xf32> to vector<8x8xf32>
      %67 = arith.addf %63, %66 : vector<8x8xf32>
      %c0_56 = arith.constant 0 : index
      %c0_57 = arith.constant 0 : index
      %68 = vector.load %arg15[%c0_56, %c0_57] : memref<8x8xf32, #tpu.memory_space<vmem>>, vector<8x8xf32>
      tpu.vector_store %arg15[%c0_56, %c0_57], %67 {strides = array<i32>} : memref<8x8xf32, #tpu.memory_space<vmem>>, vector<8x8xf32>,
      %cst_58 = arith.constant 0xFF800000 : f32
      %69 = vector.broadcast %cst_58 : f32 to vector<8x1xf32>
      %c0_59 = arith.constant 0 : index
      %c0_60 = arith.constant 0 : index
      %70 = vector.load %arg16[%c0_59, %c0_60] : memref<8x1xf32, #tpu.memory_space<vmem>>, vector<8x1xf32>
      tpu.vector_store %arg16[%c0_59, %c0_60], %69 {strides = array<i32>} : memref<8x1xf32, #tpu.memory_space<vmem>>, vector<8x1xf32>,
      %cst_61 = arith.constant 0.000000e+00 : f32
      %71 = vector.broadcast %cst_61 : f32 to vector<8x1xf32>
      %c0_62 = arith.constant 0 : index
      %c0_63 = arith.constant 0 : index
      %72 = vector.load %arg17[%c0_62, %c0_63] : memref<8x1xf32, #tpu.memory_space<vmem>>, vector<8x1xf32>
      tpu.vector_store %arg17[%c0_62, %c0_63], %71 {strides = array<i32>} : memref<8x1xf32, #tpu.memory_space<vmem>>, vector<8x1xf32>,
      %cst_64 = arith.constant 0.000000e+00 : f32
      %73 = vector.broadcast %cst_64 : f32 to vector<8x8xf32>
      %c0_65 = arith.constant 0 : index
      %c0_66 = arith.constant 0 : index
      %74 = vector.load %arg18[%c0_65, %c0_66] : memref<8x8xf32, #tpu.memory_space<vmem>>, vector<8x8xf32>
      tpu.vector_store %arg18[%c0_65, %c0_66], %73 {strides = array<i32>} : memref<8x8xf32, #tpu.memory_space<vmem>>, vector<8x8xf32>,
    } else {
    }
    %c0 = arith.constant 0 : index
    %c0_4 = arith.constant 0 : index
    %c0_5 = arith.constant 0 : index
    %8 = vector.load %arg5[%c0, %c0_4, %c0_5] : memref<1x8x32xf32, #tpu.memory_space<vmem>>, vector<1x8x32xf32>
    %9 = vector.shape_cast %8 : vector<1x8x32xf32> to vector<8x32xf32>
    %c0_6 = arith.constant 0 : index
    %c0_7 = arith.constant 0 : index
    %c0_8 = arith.constant 0 : index
    %10 = vector.load %arg7[%c0_6, %c0_7, %c0_8] : memref<1x32x8xf32, #tpu.memory_space<vmem>>, vector<1x32x8xf32>
    %11 = vector.shape_cast %10 : vector<1x32x8xf32> to vector<32x8xf32>
    %cst = arith.constant dense<0.000000e+00> : vector<8x8xf32>
    %12 = tpu.matmul %9, %11, %cst {dimension_numbers = #tpu.dot_dimension_numbers<[1], [0], [0], [1], [0, 0, 1, 1], [], []>} : vector<8x32xf32>, vector<32x8xf32>, vector<8x8xf32> -> vector<8x8xf32>
    %c0_9 = arith.constant 0 : index
    %c0_10 = arith.constant 0 : index
    %c0_11 = arith.constant 0 : index
    %13 = vector.load %arg11[%c0_9, %c0_10, %c0_11] : memref<1x1x8xf32, #tpu.memory_space<vmem>>, vector<1x1x8xf32>
    %14 = vector.shape_cast %13 : vector<1x1x8xf32> to vector<1x8xf32>
    %15 = vector.broadcast %14 : vector<1x8xf32> to vector<8x8xf32>
    %16 = arith.addf %12, %15 : vector<8x8xf32>
    %c0_12 = arith.constant 0 : index
    %c0_13 = arith.constant 0 : index
    %c0_14 = arith.constant 0 : index
    %17 = vector.load %arg5[%c0_12, %c0_13, %c0_14] : memref<1x8x32xf32, #tpu.memory_space<vmem>>, vector<1x8x32xf32>
    %18 = vector.shape_cast %17 : vector<1x8x32xf32> to vector<8x32xf32>
    %c0_15 = arith.constant 0 : index
    %c0_16 = arith.constant 0 : index
    %c0_17 = arith.constant 0 : index
    %19 = vector.load %arg8[%c0_15, %c0_16, %c0_17] : memref<1x32x8xf32, #tpu.memory_space<vmem>>, vector<1x32x8xf32>
    %20 = vector.shape_cast %19 : vector<1x32x8xf32> to vector<32x8xf32>
    %cst_18 = arith.constant dense<0.000000e+00> : vector<8x8xf32>
    %21 = tpu.matmul %18, %20, %cst_18 {dimension_numbers = #tpu.dot_dimension_numbers<[1], [0], [0], [1], [0, 0, 1, 1], [], []>} : vector<8x32xf32>, vector<32x8xf32>, vector<8x8xf32> -> vector<8x8xf32>
    %c0_19 = arith.constant 0 : index
    %c0_20 = arith.constant 0 : index
    %c0_21 = arith.constant 0 : index
    %22 = vector.load %arg12[%c0_19, %c0_20, %c0_21] : memref<1x1x8xf32, #tpu.memory_space<vmem>>, vector<1x1x8xf32>
    %23 = vector.shape_cast %22 : vector<1x1x8xf32> to vector<1x8xf32>
    %24 = vector.broadcast %23 : vector<1x8xf32> to vector<8x8xf32>
    %25 = arith.addf %21, %24 : vector<8x8xf32>
    %c0_22 = arith.constant 0 : index
    %c0_23 = arith.constant 0 : index
    %26 = vector.load %arg15[%c0_22, %c0_23] : memref<8x8xf32, #tpu.memory_space<vmem>>, vector<8x8xf32>
    %cst_24 = arith.constant dense<0.000000e+00> : vector<8x8xf32>
    %27 = tpu.matmul %26, %16, %cst_24 {dimension_numbers = #tpu.dot_dimension_numbers<[1], [1], [0], [0], [0, 0, 1, 0], [], []>} : vector<8x8xf32>, vector<8x8xf32>, vector<8x8xf32> -> vector<8x8xf32>
    %c0_25 = arith.constant 0 : index
    %c0_26 = arith.constant 0 : index
    %28 = vector.load %arg16[%c0_25, %c0_26] : memref<8x1xf32, #tpu.memory_space<vmem>>, vector<8x1xf32>
    %cst_27 = arith.constant dense<0xFF800000> : vector<8xf32>
    %29 = vector.multi_reduction <maximumf>, %27, %cst_27 [1] : vector<8x8xf32> to vector<8xf32>
    %30 = vector.shape_cast %29 : vector<8xf32> to vector<8x1xf32>
    %31 = arith.maximumf %28, %30 : vector<8x1xf32>
    %c0_28 = arith.constant 0 : index
    %c0_29 = arith.constant 0 : index
    %32 = vector.load %arg16[%c0_28, %c0_29] : memref<8x1xf32, #tpu.memory_space<vmem>>, vector<8x1xf32>
    %33 = arith.subf %32, %31 : vector<8x1xf32>
    %34 = math.exp %33 : vector<8x1xf32>
    %35 = vector.broadcast %31 : vector<8x1xf32> to vector<8x8xf32>
    %36 = arith.subf %27, %35 : vector<8x8xf32>
    %37 = math.exp %36 : vector<8x8xf32>
    %c0_30 = arith.constant 0 : index
    %c0_31 = arith.constant 0 : index
    %38 = vector.load %arg17[%c0_30, %c0_31] : memref<8x1xf32, #tpu.memory_space<vmem>>, vector<8x1xf32>
    %39 = arith.mulf %34, %38 : vector<8x1xf32>
    %cst_32 = arith.constant dense<0.000000e+00> : vector<8xf32>
    %40 = vector.multi_reduction <add>, %37, %cst_32 [1] : vector<8x8xf32> to vector<8xf32>
    %41 = vector.shape_cast %40 : vector<8xf32> to vector<8x1xf32>
    %42 = arith.addf %39, %41 : vector<8x1xf32>
    %c0_33 = arith.constant 0 : index
    %c0_34 = arith.constant 0 : index
    %43 = vector.load %arg17[%c0_33, %c0_34] : memref<8x1xf32, #tpu.memory_space<vmem>>, vector<8x1xf32>
    tpu.vector_store %arg17[%c0_33, %c0_34], %42 {strides = array<i32>} : memref<8x1xf32, #tpu.memory_space<vmem>>, vector<8x1xf32>,
    %c0_35 = arith.constant 0 : index
    %c0_36 = arith.constant 0 : index
    %44 = vector.load %arg18[%c0_35, %c0_36] : memref<8x8xf32, #tpu.memory_space<vmem>>, vector<8x8xf32>
    %45 = vector.broadcast %34 : vector<8x1xf32> to vector<8x8xf32>
    %46 = arith.mulf %45, %44 : vector<8x8xf32>
    %cst_37 = arith.constant dense<0.000000e+00> : vector<8x8xf32>
    %47 = tpu.matmul %37, %25, %cst_37 {dimension_numbers = #tpu.dot_dimension_numbers<[1], [0], [0], [1], [0, 0, 1, 1], [], []>} : vector<8x8xf32>, vector<8x8xf32>, vector<8x8xf32> -> vector<8x8xf32>
    %48 = arith.addf %46, %47 : vector<8x8xf32>
    %c0_38 = arith.constant 0 : index
    %c0_39 = arith.constant 0 : index
    %49 = vector.load %arg18[%c0_38, %c0_39] : memref<8x8xf32, #tpu.memory_space<vmem>>, vector<8x8xf32>
    tpu.vector_store %arg18[%c0_38, %c0_39], %48 {strides = array<i32>} : memref<8x8xf32, #tpu.memory_space<vmem>>, vector<8x8xf32>,
    %c0_40 = arith.constant 0 : index
    %c0_41 = arith.constant 0 : index
    %50 = vector.load %arg16[%c0_40, %c0_41] : memref<8x1xf32, #tpu.memory_space<vmem>>, vector<8x1xf32>
    tpu.vector_store %arg16[%c0_40, %c0_41], %31 {strides = array<i32>} : memref<8x1xf32, #tpu.memory_space<vmem>>, vector<8x1xf32>,
    %c0_i32_42 = arith.constant 0 : i32
    %51 = arith.cmpi eq, %arg3, %c0_i32_42 : i32
    %52 = arith.extui %51 : i1 to i32
    %c0_i32_43 = arith.constant 0 : i32
    %53 = arith.cmpi ne, %52, %c0_i32_43 : i32
    scf.if %53 {
      %c0_46 = arith.constant 0 : index
      %c0_47 = arith.constant 0 : index
      %59 = vector.load %arg18[%c0_46, %c0_47] : memref<8x8xf32, #tpu.memory_space<vmem>>, vector<8x8xf32>
      %c0_48 = arith.constant 0 : index
      %c0_49 = arith.constant 0 : index
      %60 = vector.load %arg17[%c0_48, %c0_49] : memref<8x1xf32, #tpu.memory_space<vmem>>, vector<8x1xf32>
      %61 = tpu.reciprocal %60 : vector<8x1xf32> -> vector<8x1xf32>
      %62 = vector.broadcast %61 : vector<8x1xf32> to vector<8x8xf32>
      %63 = arith.mulf %59, %62 : vector<8x8xf32>
      %c0_50 = arith.constant 0 : index
      %c0_51 = arith.constant 0 : index
      %64 = vector.load %arg19[%c0_50, %c0_51] : memref<8x32xf32, #tpu.memory_space<vmem>>, vector<8x32xf32>
      %c0_52 = arith.constant 0 : index
      %c0_53 = arith.constant 0 : index
      %c0_54 = arith.constant 0 : index
      %65 = vector.load %arg9[%c0_52, %c0_53, %c0_54] : memref<1x8x32xf32, #tpu.memory_space<vmem>>, vector<1x8x32xf32>
      %66 = vector.shape_cast %65 : vector<1x8x32xf32> to vector<8x32xf32>
      %cst_55 = arith.constant dense<0.000000e+00> : vector<8x32xf32>
      %67 = tpu.matmul %63, %66, %cst_55 {dimension_numbers = #tpu.dot_dimension_numbers<[1], [0], [0], [1], [0, 0, 1, 1], [], []>} : vector<8x8xf32>, vector<8x32xf32>, vector<8x32xf32> -> vector<8x32xf32>
      %68 = arith.addf %64, %67 : vector<8x32xf32>
      %c0_56 = arith.constant 0 : index
      %c0_57 = arith.constant 0 : index
      %69 = vector.load %arg19[%c0_56, %c0_57] : memref<8x32xf32, #tpu.memory_space<vmem>>, vector<8x32xf32>
      tpu.vector_store %arg19[%c0_56, %c0_57], %68 {strides = array<i32>} : memref<8x32xf32, #tpu.memory_space<vmem>>, vector<8x32xf32>,
    } else {
    }
    %c3_i32 = arith.constant 3 : i32
    %54 = arith.cmpi eq, %arg2, %c3_i32 : i32
    %c0_i32_44 = arith.constant 0 : i32
    %55 = arith.cmpi eq, %arg3, %c0_i32_44 : i32
    %56 = arith.andi %54, %55 : i1
    %57 = arith.extui %56 : i1 to i32
    %c0_i32_45 = arith.constant 0 : i32
    %58 = arith.cmpi ne, %57, %c0_i32_45 : i32
    scf.if %58 {
      %c0_46 = arith.constant 0 : index
      %c0_47 = arith.constant 0 : index
      %59 = vector.load %arg19[%c0_46, %c0_47] : memref<8x32xf32, #tpu.memory_space<vmem>>, vector<8x32xf32>
      %c0_48 = arith.constant 0 : index
      %c0_49 = arith.constant 0 : index
      %60 = vector.load %arg13[%c0_48, %c0_49] : memref<1x32xf32, #tpu.memory_space<vmem>>, vector<1x32xf32>
      %61 = vector.broadcast %60 : vector<1x32xf32> to vector<8x32xf32>
      %62 = arith.addf %59, %61 : vector<8x32xf32>
      %c0_50 = arith.constant 0 : index
      %c0_51 = arith.constant 0 : index
      %c0_52 = arith.constant 0 : index
      %63 = vector.load %arg14[%c0_50, %c0_51, %c0_52] : memref<1x8x32xf32, #tpu.memory_space<vmem>>, vector<1x8x32xf32>
      %64 = vector.shape_cast %63 : vector<1x8x32xf32> to vector<8x32xf32>
      %65 = vector.shape_cast %62 : vector<8x32xf32> to vector<1x8x32xf32>
      tpu.vector_store %arg14[%c0_50, %c0_51, %c0_52], %65 {strides = array<i32>} : memref<1x8x32xf32, #tpu.memory_space<vmem>>, vector<1x8x32xf32>,
    } else {
    }
    return
  }
  func.func @transform_0(%arg0: i32, %arg1: i32, %arg2: i32, %arg3: i32) -> (i32, i32, i32) {
    %c0_i32 = arith.constant 0 : i32
    %c0_i32_0 = arith.constant 0 : i32
    return %arg0, %arg1, %c0_i32 : i32, i32, i32
  }
  func.func @transform_1(%arg0: i32, %arg1: i32, %arg2: i32, %arg3: i32) -> (i32, i32, i32) {
    %c0_i32 = arith.constant 0 : i32
    %c0_i32_0 = arith.constant 0 : i32
    return %arg0, %arg3, %c0_i32 : i32, i32, i32
  }
  func.func @transform_2(%arg0: i32, %arg1: i32, %arg2: i32, %arg3: i32) -> (i32, i32, i32) {
    %c0_i32 = arith.constant 0 : i32
    %c0_i32_0 = arith.constant 0 : i32
    %c0_i32_1 = arith.constant 0 : i32
    return %arg2, %c0_i32, %c0_i32_0 : i32, i32, i32
  }
  func.func @transform_3(%arg0: i32, %arg1: i32, %arg2: i32, %arg3: i32) -> (i32, i32, i32) {
    %c0_i32 = arith.constant 0 : i32
    %c0_i32_0 = arith.constant 0 : i32
    %c0_i32_1 = arith.constant 0 : i32
    return %arg2, %c0_i32, %c0_i32_0 : i32, i32, i32
  }
  func.func @transform_4(%arg0: i32, %arg1: i32, %arg2: i32, %arg3: i32) -> (i32, i32, i32) {
    %c0_i32 = arith.constant 0 : i32
    %c0_i32_0 = arith.constant 0 : i32
    %c0_i32_1 = arith.constant 0 : i32
    return %arg2, %c0_i32, %c0_i32_0 : i32, i32, i32
  }
  func.func @transform_5(%arg0: i32, %arg1: i32, %arg2: i32, %arg3: i32) -> (i32, i32, i32) {
    %c0_i32 = arith.constant 0 : i32
    %c0_i32_0 = arith.constant 0 : i32
    %c0_i32_1 = arith.constant 0 : i32
    return %arg2, %c0_i32, %c0_i32_0 : i32, i32, i32
  }
  func.func @transform_6(%arg0: i32, %arg1: i32, %arg2: i32, %arg3: i32) -> (i32, i32, i32) {
    %c0_i32 = arith.constant 0 : i32
    %c0_i32_0 = arith.constant 0 : i32
    %c0_i32_1 = arith.constant 0 : i32
    return %arg2, %c0_i32, %c0_i32_0 : i32, i32, i32
  }
  func.func @transform_7(%arg0: i32, %arg1: i32, %arg2: i32, %arg3: i32) -> (i32, i32, i32) {
    %c0_i32 = arith.constant 0 : i32
    %c0_i32_0 = arith.constant 0 : i32
    %c0_i32_1 = arith.constant 0 : i32
    return %arg2, %c0_i32, %c0_i32_0 : i32, i32, i32
  }
  func.func @transform_8(%arg0: i32, %arg1: i32, %arg2: i32, %arg3: i32) -> (i32, i32, i32) {
    %c0_i32 = arith.constant 0 : i32
    %c0_i32_0 = arith.constant 0 : i32
    %c0_i32_1 = arith.constant 0 : i32
    return %arg2, %c0_i32, %c0_i32_0 : i32, i32, i32
  }
  func.func @transform_9(%arg0: i32, %arg1: i32, %arg2: i32, %arg3: i32) -> (i32, i32) {
    %c0_i32 = arith.constant 0 : i32
    %c0_i32_0 = arith.constant 0 : i32
    %c0_i32_1 = arith.constant 0 : i32
    return %c0_i32, %c0_i32_0 : i32, i32
  }
  func.func @transform_10(%arg0: i32, %arg1: i32, %arg2: i32, %arg3: i32) -> (i32, i32, i32) {
    %c0_i32 = arith.constant 0 : i32
    %c0_i32_0 = arith.constant 0 : i32
    return %arg0, %arg1, %c0_i32 : i32, i32, i32
  }
}

</mosaic_0001>

<bundles_post_ra>
// kernel: tpu_custom_call.1
= control target key start
LH: loop header
LB: loop body
LE: loop exit
PB: predicated region body
PF: predicated region fallthrough
CT: control target
= control target key end

     0   :  { %s3026_s0 = inlined_call_operand.hbm [shape: f32[2,8,32], index: 0, kind: input, shape index: {}]   ;;  %s3027_s1 = inlined_call_operand.hbm [shape: f32[2,8,32], index: 1, kind: input, shape index: {}]   ;;  %s3028_s2 = inlined_call_operand.hbm [shape: f32[4,32,8], index: 2, kind: input, shape index: {}]   ;;  %s3029_s3 = inlined_call_operand.hbm [shape: f32[4,32,8], index: 3, kind: input, shape index: {}]   ;;  %s3030_s4 = inlined_call_operand.hbm [shape: f32[4,32,8], index: 4, kind: input, shape index: {}]   ;;  %s3031_s5 = inlined_call_operand.hbm [shape: f32[4,8,32], index: 5, kind: input, shape index: {}]   ;;  %s3032_s6 = inlined_call_operand.hbm [shape: f32[4,1,8], index: 6, kind: input, shape index: {}]   ;;  %s3033_s7 = inlined_call_operand.hbm [shape: f32[4,1,8], index: 7, kind: input, shape index: {}]   ;;  %s3034_s8 = inlined_call_operand.hbm [shape: f32[4,1,8], index: 8, kind: input, shape index: {}]   ;;  %s3035_s9 = inlined_call_operand.hbm [shape: f32[1,32], index: 9, kind: input, shape index: {}]   ;;  %s3036_s10 = inlined_call_operand.hbm [shape: f32[2,8,32], index: 10, kind: output, shape index: {}]  }
   0x1   :  { %3080 = sst [smem:[#allocation45_spill]] %s3026_s0 }
   0x2   :  { %3081 = sst [smem:[#allocation46_spill]] %s3027_s1 }
   0x3   :  { %3082 = sst [smem:[#allocation47_spill]] %s3028_s2 }
   0x4   :  { %3083 = sst [smem:[#allocation48_spill]] %s3029_s3 }
   0x5   :  { %3084 = sst [smem:[#allocation49_spill]] %s3030_s4 }
   0x6   :  { %3085 = sst [smem:[#allocation50_spill]] %s3031_s5 }
   0x7   :  { %3086 = sst [smem:[#allocation51_spill]] %s3032_s6 }
   0x8   :  { %3087 = sst [smem:[#allocation52_spill]] %s3033_s7 }
   0x9   :  { %3088 = sst [smem:[#allocation53_spill]] %s3034_s8 }
   0xa   :  { %3089 = sst [smem:[#allocation54_spill]] %s3035_s9 }
   0xb   :  { %3090 = sst [smem:[#allocation55_spill]] %s3036_s10 }
   0xc   :  { %15 = vsyncpa [#allocation8], 0 }
   0xd   :  { %17 = vsyncpa [#allocation8 + $0x1], 0 }
   0xe   :  { %18 = vsyncpa [#allocation11], 0 }
   0xf   :  { %20 = vsyncpa [#allocation11 + $0x1], 0 }
  0x10   :  { %21 = vsyncpa [#allocation14], 0 }
  0x11   :  { %23 = vsyncpa [#allocation14 + $0x1], 0 }
  0x12   :  { %24 = vsyncpa [#allocation17], 0 }
  0x13   :  { %26 = vsyncpa [#allocation17 + $0x1], 0 }
  0x14   :  { %27 = vsyncpa [#allocation20], 0 }
  0x15   :  { %29 = vsyncpa [#allocation20 + $0x1], 0 }
  0x16   :  { %30 = vsyncpa [#allocation23], 0 }
  0x17   :  { %31 = vsyncpa [#allocation9], 0 }
  0x18   :  { %33 = vsyncpa [#allocation9 + $0x1], 0  ;;  %s2373_s13 = smov 0   ;;  %s2375_s14 = smov 0  }
  0x19   :  { %s2377_s15 = smov 0   ;;  %s2379_s16 = smov 0  }
  0x1a   :  { %s2381_s17 = smov 0   ;;  %s2383_s18 = smov 0  }
  0x1b   :  { %s2385_s19 = smov 0   ;;  %s2387_s20 = smov 0  }
  0x1c   :  { %s2389_s21 = smov 0   ;;  %s2391_s22 = smov 0  }
  0x1d   :  { %s2393_s23 = smov 0  }
  0x1e LB: > { %3091 = sst [smem:[#allocation33_spill]] %s2265_s15  ;;  %s57_s24 = sadd.s32 1, %s2289_s21  ;;  %s2297_s23 = sphi %s2393_s23, %s39_s23   ;;  %s2293_s22 = sphi %s2391_s22, %s3165_s22   ;;  %s2289_s21 = sphi %s2389_s21, %s3164_s21   ;;  %s2285_s20 = sphi %s2387_s20, %s3163_s20   ;;  %s2281_s19 = sphi %s2385_s19, %s3162_s19   ;;  %s2277_s18 = sphi %s2383_s18, %s3161_s18   ;;  %s2273_s17 = sphi %s2381_s17, %s3169_s17   ;;  %s2269_s16 = sphi %s2379_s16, %s3168_s16   ;;  %s2265_s15 = sphi %s2377_s15, %s3159_s15   ;;  %s2261_s14 = sphi %s2375_s14, %s3167_s14   ;;  %s2257_s13 = sphi %s2373_s13, %s3166_s13  }
  0x1f   : > { %3092 = sst [smem:[#allocation34_spill]] %s2277_s18  ;;  %s65_s25 = sadd.s32 1, %s2293_s22 }
  0x20   : > { %3093 = sst [smem:[#allocation35_spill]] %s2281_s19  ;;  %p59_p0 = scmp.ge.s32.totalorder %s57_s24, 4 }
  0x21   : > { %3094 = sst [smem:[#allocation36_spill]] %s2285_s20  ;;  %s74_s26 = sadd.s32 1, %s2277_s18 }
  0x22   : > { %3095 = sst [smem:[#allocation37_spill]] %s2289_s21  ;;  %p3044_p1 = scmp.ne.s32.totalorder %s2277_s18, %s2273_s17 }
  0x23   : > { %3096 = sst [smem:[#allocation38_spill]] %s2293_s22  ;;  %p82_p2 = scmp.eq.s32.totalorder %s2297_s23, 0 }
  0x24   : > { %s3171_s24 = smov (%p59_p0, %s57_s24), 0  ;;  %s3173_s25 = smov (!%p59_p0, %s65_s25), %s2293_s22 }
  0x25   : > { %3097 = sst [smem:[#allocation39_spill]] %s3171_s24  ;;  %p2440_p3 = por %p82_p2, %p3044_p1 }
  0x26   : > { %s125_s28 = ssub.s32 %s2289_s21, %s3171_s24  ;;  %p67_p4 = scmp.ge.s32.totalorder %s3173_s25, 2 }
  0x27   : > { %p126_p5 = scmp.eq.s32.totalorder %s125_s28, 0  ;;  %s128_s29 = sadd.s32 1, %s2265_s15 }
  0x28   : > { %p135_p6 = scmp.ne.s32.totalorder %s2265_s15, %s2261_s14  ;;  %s3175_s25 = smov (%p67_p4, %s3173_s25), 0 }
  0x29   : > { %3099 = sst [smem:[#allocation40_spill]] %s3175_s25  ;;  %s69_s11 = ssub.s32 %s2293_s22, %s3175_s25 }
  0x2a   : > { %s2452_s30 = scalar_select %p126_p5, %s2265_s15, %s128_s29  }
  0x2b   : > { %p137_p7 = por %p135_p6, %p82_p2  ;;  %p72_p8 = scmp.eq.s32.totalorder %s69_s11, 0 }
  0x2c   : > { %3100 = sst [smem:[#allocation41_spill]] %s2452_s30  ;;  %p1745_p9 = scmp.lt.s32.totalorder %s2297_s23, 8 }
  0x2d   : > { %s3040_s12 = sand.u32 1, %s2277_s18   ;;  %s3042_s28 = sshll.u32 %s2293_s22, 7 }
  0x2e   : > { %s2459_s10 = scalar_select %p72_p8, %s2277_s18, %s74_s26  }
  0x2f   : > { %s2463_s24 = sshll.u32 %s3040_s12, 3  ;;  %p2468_p10 = pnand %p1745_p9, %p2440_p3 }
  0x30   : > { %3101 = sst [smem:[#allocation42_spill]] %s2459_s10  ;;  %s2473_s29 = sand.u32 1, %s2297_s23  }
  0x31   : > { %s3102_s20 = scalar_select %p2468_p10, 1, 0 }
  0x32   : > { %s3103_s1 = sld [smem:[#allocation46_spill]]  ;;  %s404_s27 = scalar_lea.vmem [#allocation10], %s2463_s24 }
  0x33   : > { %s412_s12 = sshll.u32 %s404_s27, 4  ;;  %p2483_p11 = pnand %p1745_p9, %p137_p7  ;;  %s2487_s12 = int_to_ptr.vmem [resolvable:$true] %s412_s12 }
  0x34   : > { %s2490_s30 = sand.u32 1, %s2265_s15   ;;  %p3048_p13 = pneg %p2468_p10 }
  0x35   : > { %s3104_s10 = scalar_select %p2483_p11, 1, 0 }
  0x38   : > { %s2480_s26 = scalar_lea.hbm %s3103_s1, %s3042_s28  ;;  %s1858_s27 = scalar_lea.hbm %s3103_s1, 256 }
  0x39   : > { %s1853_s8 = scalar_lea.hbm %s2480_s26, 128  ;;  %p1859_p3 = scmp.lt.u32.totalorder %s2480_s26, %s3103_s1 }
  0x3a   : > { %p1854_p12 = scmp.ne.s32.totalorder %s2480_s26, %s1853_s8  ;;  %p1860_p4 = scmp.lt.u32.totalorder %s1858_s27, %s1853_s8 }
  0x3b   : > { %p1862_p6 = scmp.lt.u32.totalorder %s1853_s8, %s2480_s26 }
  0x3c   : > { %p1856_p0 = pnand %p3048_p13, %p1854_p12  ;;  %p1861_p5 = por %p1860_p4, %p1859_p3 }
  0x3e   : > { %p1857_p2 = pneg %p1856_p0  ;;  %p1863_p7 = por %p1862_p6, %p1861_p5 }
  0x40   : > { %p1864_p8 = pnand %p1863_p7, %p1857_p2 }
  0x42   : > { %1867 = shalt.err (!%p1864_p8)
}
  0x43   : > { %s1868_s19 = scalar_lea.vmem %s2487_s12, 128  ;;  %s2299_s25 = smov [#allocation10]  }
  0x44   : > { %p1869_p9 = scmp.ne.s32.totalorder %s2487_s12, %s1868_s19  ;;  %s1873_s11 = sshll.u32 %s2299_s25, 4  ;;  %s1874_s11 = int_to_ptr.vmem [resolvable:$false] %s1873_s11 }
  0x45   : > { %s1875_s6 = scalar_lea.vmem %s1874_s11, 256  ;;  %p1876_p1 = scmp.lt.s32.totalorder %s2487_s12, %s1874_s11 }
  0x46   : > { %p1871_p12 = pnand %p1869_p9, %p3048_p13  ;;  %p1877_p3 = scmp.lt.s32.totalorder %s1875_s6, %s1868_s19 }
  0x48   : > { %p1872_p0 = pneg %p1871_p12  ;;  %p1878_p4 = por %p1877_p3, %p1876_p1 }
  0x4a   : > { %p1879_p5 = pnand %p1878_p4, %p1872_p0 }
  0x4c   : > { %1882 = shalt.err (!%p1879_p5)
}
  0x4d   : > { %s3105_s8 = scalar_lea.sflag [#allocation11], %s2473_s29  ;;  %s2521_s28 = sshll.u32 %s2490_s30, 5 }
  0x4e   : > { %1718 = dma.hbm_to_vmem [thread:$0]  (!%p2468_p10), %s2480_s26, 128, %s2487_s12, %s3105_s8  }
  0x4f   : > { %3106 = sst [smem:[#allocation43_spill]] %s2521_s28  ;;  %s2524_s27 = sshll.u32 %s2289_s21, 9 }
  0x50   : > { %3107 = sst [smem:[#allocation44_spill]] %s2524_s27  ;;  %s3108_s3 = sld [smem:[#allocation48_spill]] }
  0x51   : > { %s444_s6 = scalar_lea.vmem [#allocation13], %s2521_s28  ;;  %s3058_s26 = scalar_lea.sflag [#allocation14], %s2473_s29 }
  0x52   : > { %s451_s1 = sshll.u32 %s444_s6, 4  ;;  %p2541_p2 = pneg %p2483_p11  ;;  %s2533_s1 = int_to_ptr.vmem [resolvable:$true] %s451_s1 }
  0x54   : > { %s3109_s15 = scalar_select %p2541_p2, 1, 0 }
  0x56   : > { %s2530_s11 = scalar_lea.hbm %s3108_s3, %s2524_s27  ;;  %s1888_s4 = scalar_lea.hbm %s3108_s3, 2048 }
  0x57   : > { %s1883_s8 = scalar_lea.hbm %s2530_s11, 512  ;;  %p1889_p8 = scmp.lt.u32.totalorder %s2530_s11, %s3108_s3 }
  0x58   : > { %p1884_p1 = scmp.ne.s32.totalorder %s2530_s11, %s1883_s8  ;;  %p1890_p9 = scmp.lt.u32.totalorder %s1888_s4, %s1883_s8 }
  0x59   : > { %p1892_p0 = scmp.lt.u32.totalorder %s1883_s8, %s2530_s11 }
  0x5a   : > { %p1886_p6 = pnand %p2541_p2, %p1884_p1  ;;  %p1891_p12 = por %p1890_p9, %p1889_p8 }
  0x5c   : > { %p1887_p7 = pneg %p1886_p6  ;;  %p1893_p3 = por %p1892_p0, %p1891_p12 }
  0x5e   : > { %p1894_p4 = pnand %p1893_p3, %p1887_p7 }
  0x60   : > { %1897 = shalt.err (!%p1894_p4)
}
  0x61   : > { %s1898_s12 = scalar_lea.vmem %s2533_s1, 512  ;;  %s2300_s19 = smov [#allocation13]  }
  0x62   : > { %p1899_p5 = scmp.ne.s32.totalorder %s2533_s1, %s1898_s12  ;;  %s1903_s25 = sshll.u32 %s2300_s19, 4  ;;  %s1904_s25 = int_to_ptr.vmem [resolvable:$false] %s1903_s25 }
  0x63   : > { %s1905_s2 = scalar_lea.vmem %s1904_s25, 1024  ;;  %p1906_p13 = scmp.lt.s32.totalorder %s2533_s1, %s1904_s25 }
  0x64   : > { %p1901_p1 = pnand %p1899_p5, %p2541_p2  ;;  %p1907_p10 = scmp.lt.s32.totalorder %s1905_s2, %s1898_s12 }
  0x66   : > { %p1902_p6 = pneg %p1901_p1  ;;  %p1908_p8 = por %p1907_p10, %p1906_p13 }
  0x68   : > { %p1909_p9 = pnand %p1908_p8, %p1902_p6 }
  0x6a   : > { %1912 = shalt.err (!%p1909_p9)
}
  0x6b   : > { %s3062_s4 = smov 128   ;;  %s3064_s8 = smov 8  }
  0x6c   : > { %1724 = dma.hbm_to_vmem [thread:$0]  (!%p2483_p11), %s2530_s11, 512, %s2533_s1, %s3058_s26, %s3062_s4, %s3062_s4, %s3064_s8  }
  0x6d   : > { %s1562_s12 = sshll.u32 %s2289_s21, 7  ;;  %s3110_s5 = sld [smem:[#allocation50_spill]] }
  0x6e   : > { %s3111_s2 = sshll.u32 %s2490_s30, 3  ;;  %s2580_s27 = sshll.u32 %s2289_s21, 4 }
  0x6f   : > { %s486_s3 = scalar_lea.vmem [#allocation16], %s3111_s2  ;;  %s3057_s9 = scalar_lea.sflag [#allocation17], %s2473_s29 }
  0x70   : > { %s493_s28 = sshll.u32 %s486_s3, 4  ;;  %s2577_s28 = int_to_ptr.vmem [resolvable:$true] %s493_s28 }
  0x73   : > { %s2573_s25 = scalar_lea.hbm %s3110_s5, %s1562_s12  ;;  %s1918_s12 = scalar_lea.hbm %s3110_s5, 512 }
  0x74   : > { %s1913_s0 = scalar_lea.hbm %s2573_s25, 128  ;;  %p1919_p12 = scmp.lt.u32.totalorder %s2573_s25, %s3110_s5 }
  0x75   : > { %p1914_p10 = scmp.ne.s32.totalorder %s2573_s25, %s1913_s0  ;;  %p1920_p0 = scmp.lt.u32.totalorder %s1918_s12, %s1913_s0 }
  0x76   : > { %p1922_p4 = scmp.lt.u32.totalorder %s1913_s0, %s2573_s25 }
  0x77   : > { %p1916_p13 = pnand %p1914_p10, %p2541_p2  ;;  %p1921_p3 = por %p1920_p0, %p1919_p12 }
  0x79   : > { %p1917_p7 = pneg %p1916_p13  ;;  %p1923_p5 = por %p1922_p4, %p1921_p3 }
  0x7b   : > { %p1924_p1 = pnand %p1923_p5, %p1917_p7 }
  0x7d   : > { %1927 = shalt.err (!%p1924_p1)
}
  0x7e   : > { %s1928_s3 = scalar_lea.vmem %s2577_s28, 128  ;;  %s2303_s2 = smov [#allocation16]  }
  0x7f   : > { %p1929_p6 = scmp.ne.s32.totalorder %s2577_s28, %s1928_s3  ;;  %s1933_s1 = sshll.u32 %s2303_s2, 4  ;;  %s1934_s1 = int_to_ptr.vmem [resolvable:$false] %s1933_s1 }
  0x80   : > { %s1935_s11 = scalar_lea.vmem %s1934_s1, 256  ;;  %p1936_p10 = scmp.lt.s32.totalorder %s2577_s28, %s1934_s1 }
  0x81   : > { %p1931_p8 = pnand %p1929_p6, %p2541_p2  ;;  %p1937_p13 = scmp.lt.s32.totalorder %s1935_s11, %s1928_s3 }
  0x83   : > { %p1932_p9 = pneg %p1931_p8  ;;  %p1938_p12 = por %p1937_p13, %p1936_p10 }
  0x85   : > { %p1939_p0 = pnand %p1938_p12, %p1932_p9 }
  0x87   : > { %1942 = shalt.err (!%p1939_p0)
}
  0x88   : > { %1730 = dma.hbm_to_vmem [thread:$0]  (!%p2483_p11), %s2573_s25, 128, %s2577_s28, %s3057_s9  }
  0x89   : > { %s3112_s7 = sld [smem:[#allocation52_spill]]  ;;  %s520_s19 = scalar_lea.vmem [#allocation19], %s2490_s30 }
  0x8a   : > { %s527_s3 = sshll.u32 %s520_s19, 4  ;;  %s3061_s2 = scalar_lea.sflag [#allocation20], %s2473_s29  ;;  %s528_s3 = int_to_ptr.vmem [resolvable:$true] %s527_s3 }
  0x8f   : > { %s2610_s6 = scalar_lea.hbm %s3112_s7, %s2580_s27  ;;  %s1948_s25 = scalar_lea.hbm %s3112_s7, 64 }
  0x90   : > { %s1943_s1 = scalar_lea.hbm %s2610_s6, 16  ;;  %p1949_p5 = scmp.lt.u32.totalorder %s2610_s6, %s3112_s7 }
  0x91   : > { %p1944_p7 = scmp.ne.s32.totalorder %s2610_s6, %s1943_s1  ;;  %p1950_p1 = scmp.lt.u32.totalorder %s1948_s25, %s1943_s1 }
  0x92   : > { %p1952_p8 = scmp.lt.u32.totalorder %s1943_s1, %s2610_s6 }
  0x93   : > { %p1946_p3 = pnand %p1944_p7, %p2541_p2  ;;  %p1951_p6 = por %p1950_p1, %p1949_p5 }
  0x95   : > { %p1947_p4 = pneg %p1946_p3  ;;  %p1953_p9 = por %p1952_p8, %p1951_p6 }
  0x97   : > { %p1954_p10 = pnand %p1953_p9, %p1947_p4 }
  0x99   : > { %1957 = shalt.err (!%p1954_p10)
}
  0x9a   : > { %s1958_s19 = scalar_lea.vmem %s528_s3, 16  ;;  %s2304_s9 = smov [#allocation19]  }
  0x9b   : > { %p1959_p13 = scmp.ne.s32.totalorder %s528_s3, %s1958_s19  ;;  %s1963_s26 = sshll.u32 %s2304_s9, 4  ;;  %s1964_s26 = int_to_ptr.vmem [resolvable:$false] %s1963_s26 }
  0x9c   : > { %s1965_s11 = scalar_lea.vmem %s1964_s26, 32  ;;  %p1966_p7 = scmp.lt.s32.totalorder %s528_s3, %s1964_s26 }
  0x9d   : > { %p1961_p12 = pnand %p1959_p13, %p2541_p2  ;;  %p1967_p3 = scmp.lt.s32.totalorder %s1965_s11, %s1958_s19 }
  0x9f   : > { %p1962_p0 = pneg %p1961_p12  ;;  %p1968_p11 = por %p1967_p3, %p1966_p7 }
  0xa1   : > { %p1969_p1 = pnand %p1968_p11, %p1962_p0 }
  0xa3   : > { %1972 = shalt.err (!%p1969_p1)
}
  0xa4   : > { %p3113_p5 = scmp.ne.s32.totalorder %s3104_s10, 0  ;;  %s2634_s9 = sadd.s32 4294967295, %s2297_s23  }
  0xa5   : > { %s1544_s26 = sadd.s32 4294967294, %s2297_s23   ;;  %p87_p11 = scmp.ne.s32.totalorder %s2273_s17, %s2269_s16 }
  0xa6   : > { %1736 = dma.hbm_to_vmem [thread:$0]  (!%p3113_p5), %s2610_s6, 16, %s528_s3, %s3061_s2  }
  0xa7   : > { %p3067_p4 = scmp.eq.s32.totalorder %s2634_s9, 0  ;;  %p141_p6 = scmp.ne.s32.totalorder %s2261_s14, %s2257_s13 }
  0xa8   : > { %p344_p8 = scmp.eq.s32.totalorder %s2634_s9, 7  ;;  %p350_p9 = scmp.eq.s32.totalorder %s1544_s26, 7 }
  0xa9   : > { %p2645_p10 = por %p3067_p4, %p87_p11  ;;  %p2651_p13 = por %p141_p6, %p3067_p4 }
  0xaa   : > { %p3116_p12 = scmp.ne.s32.totalorder %s2277_s18, %s2273_s17  ;;  %p2662_p7 = por %p350_p9, %p87_p11 }
  0xab   : > { %s3114_s1 = scalar_select %p2645_p10, 1, 0 }
  0xac   : > { %s3115_s6 = scalar_select %p2651_p13, 1, 0 }
  0xad   : > { %p2658_p0 = por %p344_p8, %p3116_p12  ;;  %p1545_p3 = scmp.ge.s32.totalorder %s2297_s23, 1 }
  0xae   : > { %s3118_s13 = scalar_select %p2662_p7, 1, 0 }
  0xaf   : > { %s3117_s3 = scalar_select %p2658_p0, 1, 0 }
  0xb0   : > { %p357_p1 = scmp.lt.s32.totalorder %s2297_s23, 9  ;;  %s2305_s25 = smov [#allocation22]  }
  0xb1   : > { %s370_s0 = sshll.u32 %s2305_s25, 4  ;;  %s3120_s12 = sshll.u32 %s2293_s22, 7  ;;  %s2672_s0 = int_to_ptr.vmem [resolvable:$true] %s370_s0 }
  0xb2   : > { %p2668_p5 = pnand %p1545_p3, %p357_p1  ;;  %s3121_s26 = sld [smem:[#allocation45_spill]] }
  0xb3   : > { %s385_s4 = scalar_lea.vmem [#allocation7], %s2463_s24  ;;  %s3123_s25 = sand.u32 1, %s2277_s18  }
  0xb4   : > { %s3119_s28 = scalar_select %p2668_p5, 1, 0 }
  0xb5   : > { %p1708_p6 = pneg %p2668_p5  ;;  %s393_s8 = sshll.u32 %s385_s4, 4  ;;  %s394_s8 = int_to_ptr.vmem [resolvable:$true] %s393_s8 }
  0xb6   : > { %s382_s7 = scalar_lea.sflag [#allocation8], %s3123_s25  ;;  %p3124_p9 = scmp.ne.s32.totalorder %s3102_s20, 0 }
  0xb7   : > { %p2686_p11 = pnand %p1708_p6, %p3067_p4 }
  0xb8   : > { %s2681_s2 = scalar_lea.hbm %s3121_s26, %s3120_s12  ;;  %p3125_p12 = pneg %p3124_p9 }
  0xb9   : > { %s3122_s5 = scalar_select %p2686_p11, 1, 0 }
  0xba   : > { %s1973_s22 = scalar_lea.hbm %s2681_s2, 128  ;;  %s1978_s11 = scalar_lea.hbm %s3121_s26, 256 }
  0xbb   : > { %p1974_p8 = scmp.ne.s32.totalorder %s2681_s2, %s1973_s22  ;;  %p1979_p6 = scmp.lt.u32.totalorder %s2681_s2, %s3121_s26 }
  0xbc   : > { %p1980_p4 = scmp.lt.u32.totalorder %s1978_s11, %s1973_s22  ;;  %p1982_p0 = scmp.lt.u32.totalorder %s1973_s22, %s2681_s2 }
  0xbd   : > { %p1976_p3 = pnand %p1974_p8, %p3125_p12 }
  0xbe   : > { %p1981_p7 = por %p1980_p4, %p1979_p6 }
  0xbf   : > { %p1977_p1 = pneg %p1976_p3 }
  0xc0   : > { %p1983_p13 = por %p1982_p0, %p1981_p7 }
  0xc2   : > { %p1984_p10 = pnand %p1983_p13, %p1977_p1 }
  0xc4   : > { %1987 = shalt.err (!%p1984_p10)
}
  0xc5   : > { %s1988_s25 = scalar_lea.vmem %s394_s8, 128  ;;  %p3126_p8 = pmov %p3125_p12 }
  0xc6   : > { %p1989_p5 = scmp.ne.s32.totalorder %s394_s8, %s1988_s25  ;;  %s2306_s21 = smov [#allocation7]  }
  0xc7   : > { %s1993_s12 = sshll.u32 %s2306_s21, 4  ;;  %s1994_s12 = int_to_ptr.vmem [resolvable:$false] %s1993_s12 }
  0xc8   : > { %p1991_p12 = pnand %p1989_p5, %p3126_p8  ;;  %s1995_s19 = scalar_lea.vmem %s1994_s12, 256 }
  0xc9   : > { %p1996_p2 = scmp.lt.s32.totalorder %s394_s8, %s1994_s12  ;;  %p1997_p11 = scmp.lt.s32.totalorder %s1995_s19, %s1988_s25 }
  0xca   : > { %p1992_p3 = pneg %p1991_p12 }
  0xcb   : > { %p1998_p4 = por %p1997_p11, %p1996_p2 }
  0xcd   : > { %p1999_p6 = pnand %p1998_p4, %p1992_p3 }
  0xcf   : > { %2002 = shalt.err (!%p1999_p6)
}
  0xd0   : > { %1715 = dma.hbm_to_vmem [thread:$0]  (!%p3124_p9), %s2681_s2, 128, %s394_s8, %s382_s7  }
  0xd1   : > { %s3127_s24 = sld [smem:[#allocation54_spill]]  ;;  %p3128_p10 = scmp.ne.s32.totalorder %s3122_s5, 0 }
  0xd3   : > { %p2005_p13 = pneg %p3128_p10 }
  0xd7   : > { %s2003_s4 = scalar_lea.hbm %s3127_s24, 16 }
  0xd8   : > { %p2004_p5 = scmp.ne.s32.totalorder %s3127_s24, %s2003_s4  ;;  %p2010_p2 = scmp.lt.u32.totalorder %s2003_s4, %s3127_s24 }
  0xda   : > { %p2006_p0 = pnand %p2005_p13, %p2004_p5 }
  0xdc   : > { %p2007_p7 = pneg %p2006_p0 }
  0xde   : > { %p2012_p11 = pnand %p2010_p2, %p2007_p7 }
  0xe0   : > { %2015 = shalt.err (!%p2012_p11)
}
  0xe1   : > { %s2016_s7 = scalar_lea.vmem %s2672_s0, 16  ;;  %s2023_s18 = scalar_lea.vmem %s2672_s0, 32 }
  0xe2   : > { %p2017_p9 = scmp.ne.s32.totalorder %s2672_s0, %s2016_s7  ;;  %p2024_p12 = scmp.lt.s32.totalorder %s2672_s0, %s2672_s0 }
  0xe3   : > { %p2025_p3 = scmp.lt.s32.totalorder %s2023_s18, %s2016_s7 }
  0xe4   : > { %p2019_p1 = pnand %p2017_p9, %p2005_p13 }
  0xe5   : > { %p2026_p4 = por %p2025_p3, %p2024_p12 }
  0xe6   : > { %p2020_p8 = pneg %p2019_p1 }
  0xe8   : > { %p2027_p6 = pnand %p2026_p4, %p2020_p8 }
  0xea   : > { %2030 = shalt.err (!%p2027_p6)
}
  0xeb   : > { %s3129_s2 = sld [smem:[#allocation44_spill]]  ;;  %s3130_s26 = sld [smem:[#allocation43_spill]] }
  0xec   : > { %1711 = dma.hbm_to_vmem [thread:$0]  (!%p3128_p10), %s3127_s24, 16, %s2672_s0, [#allocation23]  }
  0xed   : > { %s3131_s22 = sld [smem:[#allocation47_spill]]  ;;  %p3133_p13 = scmp.ne.s32.totalorder %s3109_s15, 0 }
  0xf1   : > { %s423_s21 = scalar_lea.vmem [#allocation12], %s3130_s26 }
  0xf2   : > { %s430_s25 = sshll.u32 %s423_s21, 4  ;;  %s2740_s25 = int_to_ptr.vmem [resolvable:$true] %s430_s25 }
  0xf3   : > { %s3132_s11 = smov %s3131_s22  ;;  %s2737_s4 = scalar_lea.hbm %s3131_s22, %s3129_s2 }
  0xf4   : > { %s2031_s5 = scalar_lea.hbm %s2737_s4, 512  ;;  %s2036_s18 = scalar_lea.hbm %s3132_s11, 2048 }
  0xf5   : > { %p2032_p5 = scmp.ne.s32.totalorder %s2737_s4, %s2031_s5  ;;  %p2037_p10 = scmp.lt.u32.totalorder %s2737_s4, %s3132_s11 }
  0xf6   : > { %p2038_p2 = scmp.lt.u32.totalorder %s2036_s18, %s2031_s5  ;;  %p2040_p9 = scmp.lt.u32.totalorder %s2031_s5, %s2737_s4 }
  0xf7   : > { %p2034_p0 = pnand %p2032_p5, %p3133_p13 }
  0xf8   : > { %p2039_p11 = por %p2038_p2, %p2037_p10 }
  0xf9   : > { %p2035_p7 = pneg %p2034_p0 }
  0xfa   : > { %p2041_p1 = por %p2040_p9, %p2039_p11 }
  0xfc   : > { %p2042_p8 = pnand %p2041_p1, %p2035_p7 }
  0xfe   : > { %2045 = shalt.err (!%p2042_p8)
}
  0xff   : > { %s2046_s12 = scalar_lea.vmem %s2740_s25, 512  ;;  %s2307_s19 = smov [#allocation12]  }
 0x100   : > { %p2047_p12 = scmp.ne.s32.totalorder %s2740_s25, %s2046_s12  ;;  %s2051_s22 = sshll.u32 %s2307_s19, 4  ;;  %s2052_s22 = int_to_ptr.vmem [resolvable:$false] %s2051_s22 }
 0x101   : > { %s2053_s21 = scalar_lea.vmem %s2052_s22, 1024  ;;  %p2054_p6 = scmp.lt.s32.totalorder %s2740_s25, %s2052_s22 }
 0x102   : > { %p2049_p3 = pnand %p2047_p12, %p3133_p13  ;;  %p2055_p5 = scmp.lt.s32.totalorder %s2053_s21, %s2046_s12 }
 0x104   : > { %p2050_p4 = pneg %p2049_p3  ;;  %p2056_p0 = por %p2055_p5, %p2054_p6 }
 0x106   : > { %p2057_p10 = pnand %p2056_p0, %p2050_p4 }
 0x108   : > { %2060 = shalt.err (!%p2057_p10)
}
 0x109   : > { %p3134_p7 = scmp.ne.s32.totalorder %s3104_s10, 0  ;;  %s3135_s5 = smov 8  }
 0x10a   : > { %s3136_s7 = smov 128   ;;  %s3137_s0 = scalar_lea.sflag [#allocation11], %s2473_s29 }
 0x10b   : > { %1721 = dma.hbm_to_vmem [thread:$0]  (!%p3134_p7), %s2737_s4, 512, %s2740_s25, %s3137_s0, %s3136_s7, %s3136_s7, %s3135_s5  }
 0x10c   : > { %s3138_s8 = sld [smem:[#allocation49_spill]]  ;;  %s465_s19 = scalar_lea.vmem [#allocation15], %s3130_s26 }
 0x10d   : > { %s472_s22 = sshll.u32 %s465_s19, 4  ;;  %s2775_s22 = int_to_ptr.vmem [resolvable:$true] %s472_s22 }
 0x112   : > { %s2772_s12 = scalar_lea.hbm %s3138_s8, %s3129_s2  ;;  %s2066_s25 = scalar_lea.hbm %s3138_s8, 2048 }
 0x113   : > { %s2061_s21 = scalar_lea.hbm %s2772_s12, 512  ;;  %p2067_p1 = scmp.lt.u32.totalorder %s2772_s12, %s3138_s8 }
 0x114   : > { %p2062_p2 = scmp.ne.s32.totalorder %s2772_s12, %s2061_s21  ;;  %p2068_p8 = scmp.lt.u32.totalorder %s2066_s25, %s2061_s21 }
 0x115   : > { %p2070_p3 = scmp.lt.u32.totalorder %s2061_s21, %s2772_s12 }
 0x116   : > { %p2064_p11 = pnand %p2062_p2, %p3133_p13  ;;  %p2069_p12 = por %p2068_p8, %p2067_p1 }
 0x118   : > { %p2065_p9 = pneg %p2064_p11  ;;  %p2071_p4 = por %p2070_p3, %p2069_p12 }
 0x11a   : > { %p2072_p6 = pnand %p2071_p4, %p2065_p9 }
 0x11c   : > { %2075 = shalt.err (!%p2072_p6)
}
 0x11d   : > { %s2076_s26 = scalar_lea.vmem %s2775_s22, 512  ;;  %s2308_s11 = smov [#allocation15]  }
 0x11e   : > { %p2077_p5 = scmp.ne.s32.totalorder %s2775_s22, %s2076_s26  ;;  %s2081_s18 = sshll.u32 %s2308_s11, 4  ;;  %s2082_s18 = int_to_ptr.vmem [resolvable:$false] %s2081_s18 }
 0x11f   : > { %s2083_s20 = scalar_lea.vmem %s2082_s18, 1024  ;;  %p2084_p2 = scmp.lt.s32.totalorder %s2775_s22, %s2082_s18 }
 0x120   : > { %p2079_p0 = pnand %p2077_p5, %p3133_p13  ;;  %p2085_p11 = scmp.lt.s32.totalorder %s2083_s20, %s2076_s26 }
 0x122   : > { %p2080_p10 = pneg %p2079_p0  ;;  %p2086_p1 = por %p2085_p11, %p2084_p2 }
 0x124   : > { %p2087_p8 = pnand %p2086_p1, %p2080_p10 }
 0x126   : > { %2090 = shalt.err (!%p2087_p8)
}
 0x127   : > { %s3139_s19 = scalar_lea.sflag [#allocation14], %s2473_s29  ;;  %s3140_s25 = sld [smem:[#allocation51_spill]] }
 0x128   : > { %1727 = dma.hbm_to_vmem [thread:$0]  (!%p3134_p7), %s2772_s12, 512, %s2775_s22, %s3139_s19, %s3136_s7, %s3136_s7, %s3135_s5  }
 0x129   : > { %s503_s2 = scalar_lea.vmem [#allocation18], %s2490_s30 }
 0x12a   : > { %s510_s26 = sshll.u32 %s503_s2, 4  ;;  %s511_s26 = int_to_ptr.vmem [resolvable:$true] %s510_s26 }
 0x12d   : > { %s2807_s0 = scalar_lea.hbm %s3140_s25, %s2580_s27  ;;  %s2096_s5 = scalar_lea.hbm %s3140_s25, 64 }
 0x12e   : > { %s2091_s11 = scalar_lea.hbm %s2807_s0, 16  ;;  %p2097_p4 = scmp.lt.u32.totalorder %s2807_s0, %s3140_s25 }
 0x12f   : > { %p2092_p9 = scmp.ne.s32.totalorder %s2807_s0, %s2091_s11  ;;  %p2098_p6 = scmp.lt.u32.totalorder %s2096_s5, %s2091_s11 }
 0x130   : > { %p2100_p0 = scmp.lt.u32.totalorder %s2091_s11, %s2807_s0 }
 0x131   : > { %p2094_p12 = pnand %p2092_p9, %p3133_p13  ;;  %p2099_p5 = por %p2098_p6, %p2097_p4 }
 0x133   : > { %p2095_p3 = pneg %p2094_p12  ;;  %p2101_p10 = por %p2100_p0, %p2099_p5 }
 0x135   : > { %p2102_p2 = pnand %p2101_p10, %p2095_p3 }
 0x137   : > { %2105 = shalt.err (!%p2102_p2)
}
 0x138   : > { %s2106_s22 = scalar_lea.vmem %s511_s26, 16  ;;  %s2309_s19 = smov [#allocation18]  }
 0x139   : > { %p2107_p11 = scmp.ne.s32.totalorder %s511_s26, %s2106_s22  ;;  %s2111_s21 = sshll.u32 %s2309_s19, 4  ;;  %s2112_s21 = int_to_ptr.vmem [resolvable:$false] %s2111_s21 }
 0x13a   : > { %s2113_s4 = scalar_lea.vmem %s2112_s21, 32  ;;  %p2114_p9 = scmp.lt.s32.totalorder %s511_s26, %s2112_s21 }
 0x13b   : > { %p2109_p1 = pnand %p2107_p11, %p3133_p13  ;;  %p2115_p12 = scmp.lt.s32.totalorder %s2113_s4, %s2106_s22 }
 0x13d   : > { %p2110_p8 = pneg %p2109_p1  ;;  %p2116_p7 = por %p2115_p12, %p2114_p9 }
 0x13f   : > { %p2117_p4 = pnand %p2116_p7, %p2110_p8 }
 0x141   : > { %2120 = shalt.err (!%p2117_p4)
}
 0x142   : > { %p3141_p6 = scmp.ne.s32.totalorder %s3104_s10, 0  ;;  %s3142_s2 = scalar_lea.sflag [#allocation17], %s2473_s29 }
 0x143   : > { %s3143_s20 = sld [smem:[#allocation53_spill]]  ;;  %s537_s12 = scalar_lea.vmem [#allocation21], %s2490_s30 }
 0x144   : > { %1733 = dma.hbm_to_vmem [thread:$0]  (!%p3141_p6), %s2807_s0, 16, %s511_s26, %s3142_s2  }
 0x145   : > { %s544_s22 = sshll.u32 %s537_s12, 4  ;;  %s545_s22 = int_to_ptr.vmem [resolvable:$true] %s544_s22 }
 0x149   : > { %s3144_s5 = smov %s3143_s20  ;;  %s2833_s7 = scalar_lea.hbm %s3143_s20, %s2580_s27 }
 0x14a   : > { %s2121_s19 = scalar_lea.hbm %s2833_s7, 16  ;;  %s2126_s0 = scalar_lea.hbm %s3144_s5, 64 }
 0x14b   : > { %p2122_p7 = scmp.ne.s32.totalorder %s2833_s7, %s2121_s19  ;;  %p2127_p0 = scmp.lt.u32.totalorder %s2833_s7, %s3144_s5 }
 0x14c   : > { %p2128_p10 = scmp.lt.u32.totalorder %s2126_s0, %s2121_s19  ;;  %p2130_p11 = scmp.lt.u32.totalorder %s2121_s19, %s2833_s7 }
 0x14d   : > { %p2124_p3 = pnand %p2122_p7, %p3133_p13 }
 0x14e   : > { %p2129_p2 = por %p2128_p10, %p2127_p0 }
 0x14f   : > { %p2125_p5 = pneg %p2124_p3 }
 0x150   : > { %p2131_p1 = por %p2130_p11, %p2129_p2 }
 0x152   : > { %p2132_p8 = pnand %p2131_p1, %p2125_p5 }
 0x154   : > { %2135 = shalt.err (!%p2132_p8)
}
 0x155   : > { %s2136_s30 = scalar_lea.vmem %s545_s22, 16  ;;  %s2310_s27 = smov [#allocation21]  }
 0x156   : > { %p2137_p9 = scmp.ne.s32.totalorder %s545_s22, %s2136_s30  ;;  %s2141_s11 = sshll.u32 %s2310_s27, 4  ;;  %s2142_s11 = int_to_ptr.vmem [resolvable:$false] %s2141_s11 }
 0x157   : > { %s2143_s18 = scalar_lea.vmem %s2142_s11, 32  ;;  %p2144_p7 = scmp.lt.s32.totalorder %s545_s22, %s2142_s11 }
 0x158   : > { %p2139_p12 = pnand %p2137_p9, %p3133_p13  ;;  %p2145_p3 = scmp.lt.s32.totalorder %s2143_s18, %s2136_s30 }
 0x15a   : > { %p2140_p4 = pneg %p2139_p12  ;;  %p2146_p6 = por %p2145_p3, %p2144_p7 }
 0x15c   : > { %p2147_p0 = pnand %p2146_p6, %p2140_p4 }
 0x15e   : > { %2150 = shalt.err (!%p2147_p0)
}
 0x15f   : > { %p3145_p10 = scmp.ne.s32.totalorder %s3104_s10, 0  ;;  %s3146_s20 = scalar_lea.sflag [#allocation20], %s2473_s29 }
 0x160   : > { %p3147_p5 = scmp.ne.s32.totalorder %s3119_s28, 0 }
 0x161   : > { %1739 = dma.hbm_to_vmem [thread:$0]  (!%p3145_p10), %s2833_s7, 16, %s545_s22, %s3146_s20  }
 0x162   : > { %553 = sbr.rel (%p3147_p5) target bundleno = 1673 (0x689), region = 60  ;;  %s2858_s15 = sand.u32 (!%p3147_p5), 1, %s2273_s17  }
 0x163   : > { %s2861_s12 = sshll.u32 (!%p3147_p5), %s2858_s15, 3  ;;  %s556_s19 = scalar_lea.sflag (!%p3147_p5), [#allocation8], %s2858_s15 }
 0x164   : > { %s559_s21 = scalar_lea.vmem (!%p3147_p5), [#allocation7], %s2861_s12  ;;  %p3148_p13 = scmp.ne.s32.totalorder (!%p3147_p5), %s3114_s1, 0 }
 0x169   : > { %2224 = dma.done.wait (%p3148_p13), %s556_s19, 128  }
 0x16a   : > { %2226 = vsyncadd (%p3148_p13), %s556_s19, 4294967168  ;;  %s564_s10 = sand.u32 1, %s2634_s9   ;;  %s568_s28 = scalar_lea.vmem [#allocation10], %s2861_s12 }
 0x16b   : > { %s565_s29 = scalar_lea.sflag [#allocation11], %s564_s10 }
 0x16c   : > { %2228 = dma.done.wait (%p3148_p13), %s565_s29, 128  }
 0x16d   : > { %2230 = vsyncadd (%p3148_p13), %s565_s29, 4294967168  ;;  %s2876_s7 = sand.u32 1, %s2261_s14   ;;  %p3149_p6 = scmp.ne.s32.totalorder %s3115_s6, 0 }
 0x16e   : > { %s1569_s22 = sshll.u32 %s2876_s7, 5 }
 0x16f   : > { %s2879_s4 = scalar_lea.vmem [#allocation12], %s1569_s22 }
 0x170   : > { %2232 = dma.done.wait (%p3149_p6), %s565_s29, 512  }
 0x171   : > { %2234 = vsyncadd (%p3149_p6), %s565_s29, 4294966784  ;;  %s583_s0 = scalar_lea.sflag [#allocation14], %s564_s10  ;;  %s2885_s26 = scalar_lea.vmem [#allocation13], %s1569_s22 }
 0x172   : > { %2236 = dma.done.wait (%p3149_p6), %s583_s0, 1024  }
 0x173   : > { %2238 = vsyncadd (%p3149_p6), %s583_s0, 4294966272  ;;  %s1572_s1 = sshll.u32 %s2876_s7, 3  ;;  %s2892_s2 = scalar_lea.vmem [#allocation15], %s1569_s22 }
 0x174   : > { %s601_s30 = scalar_lea.sflag [#allocation17], %s564_s10  ;;  %s2894_s27 = scalar_lea.vmem [#allocation16], %s1572_s1 }
 0x175   : > { %2240 = dma.done.wait (%p3149_p6), %s601_s30, 144  }
 0x176   : > { %2242 = vsyncadd (%p3149_p6), %s601_s30, 4294967152  ;;  %s612_s11 = scalar_lea.vmem [#allocation18], %s2876_s7  ;;  %s618_s18 = scalar_lea.sflag [#allocation20], %s564_s10 }
 0x177   : > { %s620_s20 = scalar_lea.vmem [#allocation19], %s2876_s7 }
 0x178   : > { %2244 = dma.done.wait (%p3149_p6), %s618_s18, 32  }
 0x179   : > { %2246 = vsyncadd (%p3149_p6), %s618_s18, 4294967264  ;;  %s628_s19 = scalar_lea.vmem [#allocation21], %s2876_s7  ;;  %p3150_p2 = scmp.eq.s32.totalorder %s2634_s9, 0 }
 0x17b   : > { %2248 = dma.done.wait (%p3150_p2), [#allocation23], 16   ;;  %p3151_p11 = pmov %p3150_p2 }
 0x17c   : > { %s3152_s29 = sld [smem:[#allocation35_spill]]  ;;  %s705_s22 = scalar_lea.vmem [#allocation24], %s2861_s12 }
 0x17d   : > { %2250 = vsyncadd (%p3151_p11), [#allocation23], 4294967280 }
 0x182   : > { %p706_p1 = scmp.eq.s32.totalorder %s3152_s29, 0 }
 0x183   : > { %vm712_vm0 = vcmask (%p706_p1), 261120   ;;  %v2311_v0 = vmov (%p706_p1), 0.0  }
 0x184   : > { %711 = sbr.rel (!%p706_p1) target bundleno = 395 (0x18b), region = 104  ;;  %713 = vst.msk [vmem:[#allocation6] sm:$0xff] (%p706_p1), %vm712_vm0, %v2311_v0 }
 0x18b PF: > { %v718_v1 = vld [vmem:[%s2879_s4] sm:$0xff]  ;;  %v719_v2 = vld [vmem:[%s2879_s4 + $0x8] sm:$0xff]  ;;  %v2312_v4 = vmov 0.0|0.0   ;;  %v720_v7 = vld [vmem:[%s2879_s4 + $0x10] sm:$0xff]  ;;  %vm2313_vm1 = vmmov 0   ;;  %v2314_v10 = vmov 0.0  }
 0x18c   : > { %v810_v3 = vld [vmem:[%s2885_s26] sm:$0xff]  ;;  %1666 = vmatprep.subr.bf16.mxu0 %v2312_v4  ;;  %v1667_v5 = vpack.c.bf16 %v719_v2, %v718_v1  ;;  %1672 = vmatprep.subr.bf16.mxu1 %v2312_v4  ;;  %v811_v6 = vld [vmem:[%s2885_s26 + $0x8] sm:$0xff]  ;;  %v721_v8 = vld [vmem:[%s2879_s4 + $0x18] sm:$0xff]  ;;  %vm729_vm2 = vcmask 261120   ;;  %vm803_vm3 = vcmask 64512   ;;  %vm805_vm4 = vcmask 7168  }
 0x18d   : > { %v1673_v9 = vpack.c.bf16 %v811_v6, %v810_v3  ;;  %1626 = vmatprep.mubr.msk.f32.mxu0 %vm2313_vm1, %v2314_v10  ;;  %v812_v11 = vld [vmem:[%s2885_s26 + $0x10] sm:$0xff]  ;;  %v813_v12 = vld [vmem:[%s2885_s26 + $0x18] sm:$0xff]  ;;  %1637 = vmatprep.mubr.msk.f32.mxu1 %vm2313_vm1, %v2314_v10  ;;  %v1670_v13 = vpack.c.bf16 %v721_v8, %v720_v7  ;;  %v717_v15 = vld [vmem:[%s559_s21] sm:$0xff]  ;;  %808 = vst.msk [vmem:[#allocation5] sm:$0xff] %vm803_vm3, %v2314_v10  ;;  %v2315_v31 = vmov -inf   ;;  %v2316_v36 = vmov 0  }
 0x18e   : > { %1668 = vmatpush3.bf16.msra.mxu0 %v1667_v5  ;;  %v1676_v14 = vpack.c.bf16 %v813_v12, %v812_v11  ;;  %v809_v16 = vld [vmem:[%s568_s28] sm:$0xff]  ;;  %v895_v26 = vld [vmem:[%s2892_s2] sm:$0xff]  ;;  %v896_v27 = vld [vmem:[%s2892_s2 + $0x8] sm:$0xff]  ;;  %806 = vst.msk [vmem:[#allocation3] sm:$0xff] %vm805_vm4, %v2315_v31  ;;  %1845 = vset.pattern.permute.xlu0 %v2316_v36  ;;  %s3153_s9 = sld [smem:[#allocation35_spill]] }
 0x18f   : > { %1669 = vmatprep.subr.bf16.mxu0 %v2312_v4  ;;  %1674 = vmatpush3.bf16.msra.mxu1 %v1673_v9  ;;  %v1576_v17 = vld [vmem:[%s612_s11] ss:$0 sm:$0xff]  ;;  %v897_v28 = vld [vmem:[%s2892_s2 + $0x10] sm:$0xff]  ;;  %v1679_v29 = vpack.c.bf16 %v896_v27, %v895_v26  ;;  %807 = vst.msk [vmem:[#allocation4] sm:$0xff] %vm805_vm4, %v2314_v10  ;;  %v1174_v52 = vld [vmem:[%s2894_s27] sm:$0xff] }
 0x190   : > { %1675 = vmatprep.subr.bf16.mxu1 %v2312_v4  ;;  %v1578_v18 = vld [vmem:[%s620_s20] ss:$0 sm:$0xff]  ;;  %1846 = vset.pattern.permute.xlu1 %v2316_v36 }
 0x191   : > { %v898_v30 = vld [vmem:[%s2892_s2 + $0x18] sm:$0xff] }
 0x192   : > { %1671 = vmatpush3.bf16.msra.mxu0 %v1670_v13  ;;  %v1682_v32 = vpack.c.bf16 %v898_v30, %v897_v28  ;;  %v1580_v41 = vld [vmem:[%s628_s19] ss:$0 sm:$0xff] }
 0x193   : > { %1677 = vmatpush3.bf16.msra.mxu1 %v1676_v14  ;;  %1678 = vmatprep.subr.bf16.mxu0 %v2312_v4 }
 0x194   : > { %1651 = vmatprep.subr.mxu1 %v2314_v10  ;;  %v1078_v59 = vld [vmem:[#allocation5] sm:$0xff]  ;;  %p1250_p8 = scmp.eq.s32.totalorder %s3153_s9, 3 }
 0x195   : > { %1627 = vmatmul.mubr.msk.f32.vlgmr.msra.gmra.mrb[0].mxu0 %vm729_vm2, %v717_v15  ;;  %v1054_v37 = vld [vmem:[#allocation3] sm:$0xff]  ;;  %v1587_v9 = vld [vmem:[#allocation22] ss:$0 sm:$0xff] (%p1250_p8) }
 0x196   : > { %1638 = vmatmul.mubr.msk.f32.vlgmr.msra.gmra.mrb[0].mxu1 %vm729_vm2, %v809_v16  ;;  %1648 = vmatprep.mubr.msk.f32.mxu0 %vm2313_vm1, %v2314_v10  ;;  %v1070_v53 = vld [vmem:[#allocation4] sm:$0xff] }
 0x197   : > { %1653 = vmatprep.mubr.msk.f32.mxu1 %vm2313_vm1, %v2314_v10  ;;  %1680 = vmatpush3.bf16.msra.mxu0 %v1679_v29 }
 0x198   : > { %1681 = vmatprep.subr.bf16.mxu0 %v2312_v4  ;;  %v1173_v4 = vld [vmem:[#allocation6] sm:$0xff] }
 0x19b   : > { %1683 = vmatpush3.bf16.msra.mxu0 %v1682_v32 }
 0x19c   : > { %1661 = vmatprep.subr.mxu0 %v2314_v10 }
 0x19e   : > { %1649 = vmatmul.mubr.msk.f32.vlgmr.msra.gmra.mrb[2].mxu0 %vm729_vm2, %v809_v16 }
 0x19f   : > { %1663 = vmatprep.mubr.msk.f32.mxu0 %vm2313_vm1, %v2314_v10  ;;  %1662 = vmatpush3.msra.mxu0 %v1174_v52 }
 0x268   : > { %v799_v19 = vpop.f32.mrb[0].mxu0 }
 0x269   : > { %v800_v20 = vadd.f32 %v1576_v17, %v799_v19  ;;  %v1628_v21 = vpop.f32.mrb[1].mxu0  ;;  %v891_v22 = vpop.f32.mrb[0].mxu1 }
 0x26a   : > { %v892_v23 = vadd.f32 %v1578_v18, %v891_v22  ;;  %v1639_v24 = vpop.f32.mrb[1].mxu1 }
 0x26b   : > { %804 = vst.msk [vmem:[#allocation2] sm:$0xff] %vm803_vm3, %v800_v20 }
 0x26c   : > { %1652 = vmatpush3.xpose.msk.msra.mxu1 %vm803_vm3, %v892_v23 }
 0x26d   : > { %1656 = vmatprep.subr.mxu1 %v2314_v10 }
 0x271   : > { %v972_v42 = vpop.f32.mrb[2].mxu0 }
 0x272   : > { %v976_v25 = vld [vmem:[#allocation2] sm:$0xff]  ;;  %v973_v43 = vadd.f32 %v1580_v41, %v972_v42  ;;  %v1650_v44 = vpop.f32.mrb[3].mxu0 }
 0x273   : > { %1654 = vmatmul.mubr.msk.f32.vlgmr.msra.gmra.mrb[2].mxu1 %vm803_vm3, %v976_v25 }
 0x274   : > { %1658 = vmatprep.mubr.msk.f32.mxu1 %vm2313_vm1, %v2314_v10  ;;  %1657 = vmatpush3.msra.mxu1 %v973_v43 }
 0x346   : > { %v1050_v33 = vpop.f32.mrb[2].mxu1 }
 0x347   : > { %v1655_v34 = vpop.f32.mrb[3].mxu1  ;;  %v1055_v35 = vsel %vm803_vm3, %v1050_v33, -inf }
 0x348   : > { %1056 = vmax.xlane.f32.xlu0 %v1055_v35 }
 0x3d5   : > { %v1057_v38 = vpop.xlane.xlu0 %1056 }
 0x3d6   : > { %v1058_v39 = vmax.f32 %v1054_v37, %v1057_v38 }
 0x3d8   : > { %v1059_v40 = vsub.f32 %v1054_v37, %v1058_v39  ;;  %1160 = vst.msk [vmem:[#allocation3] sm:$0xff] %vm805_vm4, %v1058_v39  ;;  %1064 = vperm.xlu0 %1845, %v1058_v39  }
 0x3da   : > { %v1060_v50 = vmul.f32 1.442695, %v1059_v40 }
 0x457   : > { %v1065_v45 = vpop.permute.xlu0 %1064 }
 0x458   : > { %v1067_v46 = vsub.f32 %v1050_v33, %v1065_v45 }
 0x45a   : > { %v1068_v47 = vmul.f32 1.442695, %v1067_v46 }
 0x45c   : > { %1847 = vpow2.f32 %v1068_v47 }
 0x45d   : > { %1849 = vpow2.f32 %v1060_v50 }
 0x466   : > { %v1848_v48 = vpop.eup %1847 }
 0x467   : > { %1659 = vmatmul.mubr.msk.f32.vlgmr.msra.gmra.mrb[4].mxu1 %vm803_vm3, %v1848_v48  ;;  %v1072_v49 = vsel %vm803_vm3, %v1848_v48, 0.0  ;;  %v1850_v51 = vpop.eup %1849 }
 0x468   : > { %1073 = vadd.xlane.f32.xlu1 %v1072_v49  ;;  %v1071_v54 = vmul.f32 %v1850_v51, %v1070_v53 }
 0x479   : > { %1081 = vperm.xlu1 %1846, %v1850_v51  }
 0x4f5   : > { %v1074_v55 = vpop.xlane.xlu1 %1073 }
 0x4f6   : > { %v1075_v56 = vadd.f32 %v1074_v55, %v1071_v54 }
 0x4f8   : > { %1077 = vst.msk [vmem:[#allocation4] sm:$0xff] %vm805_vm4, %v1075_v56 }
 0x4f9   : > { %v1082_v60 = vpop.permute.xlu1 %1081 }
 0x4fa   : > { %v1084_v61 = vmul.f32 %v1082_v60, %v1078_v59 }
 0x4ff   : > { %v1165_v57 = vld [vmem:[#allocation4] sm:$0xff] }
 0x500   : > { %1851 = vrcp.f32 %v1165_v57 }
 0x50a   : > { %v1852_v58 = vpop.eup %1851 }
 0x50b   : > { %1169 = vperm.xlu1 %1846, %v1852_v58  }
 0x53a   : > { %v1154_v62 = vpop.f32.mrb[4].mxu1 }
 0x53b   : > { %v1158_v63 = vadd.f32 %v1154_v62, %v1084_v61  ;;  %v1660_v0 = vpop.f32.mrb[5].mxu1 }
 0x53d   : > { %1159 = vst.msk [vmem:[#allocation5] sm:$0xff] %vm803_vm3, %v1158_v63 }
 0x544   : > { %v1164_v2 = vld [vmem:[#allocation5] sm:$0xff] }
 0x58a   : > { %v1170_v1 = vpop.permute.xlu1 %1169 }
 0x58b   : > { %v1172_v3 = vmul.f32 %v1170_v1, %v1164_v2 }
 0x58d   : > { %1664 = vmatmul.mubr.msk.f32.vlgmr.msra.gmra.mrb[4].mxu0 %vm803_vm3, %v1172_v3 }
 0x65d   : > { %1254 = sbr.rel (!%p1250_p8) target bundleno = 1646 (0x66e), region = 116 }
 0x660   : > { %v1244_v5 = vpop.f32.mrb[4].mxu0 }
 0x661   : > { %v1248_v6 = vadd.f32 %v1244_v5, %v1173_v4  ;;  %v1665_v7 = vpop.f32.mrb[5].mxu0 }
 0x663   : > { %1249 = vst.msk [vmem:[#allocation6] sm:$0xff] %vm729_vm2, %v1248_v6 }
 0x66a   : > { %v1255_v8 = vld [vmem:[#allocation6] sm:$0xff] }
 0x66b   : > { %v1263_v10 = vadd.f32 %v1587_v9, %v1255_v8 }
 0x66d   : > { %1264 = vst.msk [vmem:[%s705_s22] sm:$0xff] %vm729_vm2, %v1263_v10 }
 0x66e PF: > { %s3154_s6 = sld [smem:[#allocation36_spill]]  ;;  %s3155_s7 = sld [smem:[#allocation55_spill]] }
 0x66f   : > { %s1280_s0 = sshll.u32 %s705_s22, 4  ;;  %s1266_s26 = scalar_lea.sflag [#allocation9], %s2858_s15  ;;  %s1281_s0 = int_to_ptr.vmem [resolvable:$true] %s1280_s0 }
 0x670   : > { %s2151_s1 = scalar_lea.vmem %s1281_s0, 128  ;;  %p3156_p12 = scmp.ne.s32.totalorder %s3117_s3, 0 }
 0x671   : > { %p2152_p9 = scmp.ne.s32.totalorder %s1281_s0, %s2151_s1  ;;  %s2317_s2 = smov [#allocation24]  }
 0x672   : > { %s2155_s30 = sshll.u32 %s2317_s2, 4  ;;  %s2156_s30 = int_to_ptr.vmem [resolvable:$false] %s2155_s30 }
 0x673   : > { %p2153_p4 = pnand %p2152_p9, %p3156_p12  ;;  %s2157_s27 = scalar_lea.vmem %s2156_s30, 256 }
 0x674   : > { %s1589_s21 = sshll.u32 %s3154_s6, 7  ;;  %p2158_p3 = scmp.lt.s32.totalorder %s1281_s0, %s2156_s30 }
 0x675   : > { %s2967_s4 = scalar_lea.hbm %s3155_s7, %s1589_s21  ;;  %p2154_p7 = pneg %p2153_p4 }
 0x676   : > { %p2159_p0 = scmp.lt.s32.totalorder %s2157_s27, %s2151_s1 }
 0x678   : > { %p2160_p10 = por %p2159_p0, %p2158_p3 }
 0x67a   : > { %p2161_p5 = pnand %p2160_p10, %p2154_p7 }
 0x67c   : > { %2164 = shalt.err (!%p2161_p5)
}
 0x67d   : > { %s2165_s15 = scalar_lea.hbm %s2967_s4, 128  ;;  %s2169_s18 = scalar_lea.hbm %s3155_s7, 256 }
 0x67e   : > { %p2166_p13 = scmp.ne.s32.totalorder %s2967_s4, %s2165_s15  ;;  %p2170_p11 = scmp.lt.u32.totalorder %s2967_s4, %s3155_s7 }
 0x67f   : > { %p2171_p1 = scmp.lt.u32.totalorder %s2169_s18, %s2165_s15  ;;  %p2173_p9 = scmp.lt.u32.totalorder %s2165_s15, %s2967_s4 }
 0x680   : > { %p2167_p6 = pnand %p2166_p13, %p3156_p12 }
 0x681   : > { %p2172_p8 = por %p2171_p1, %p2170_p11 }
 0x682   : > { %p2168_p2 = pneg %p2167_p6 }
 0x683   : > { %p2174_p4 = por %p2173_p9, %p2172_p8 }
 0x685   : > { %p2175_p7 = pnand %p2174_p4, %p2168_p2 }
 0x687   : > { %2178 = shalt.err (!%p2175_p7)
}
 0x688   : > { %1706 = dma.vmem_to_hbm [thread:$0]  (%p3156_p12), %s1281_s0, 128, %s2967_s4, %s1266_s26  }
 0x689 PF: > { %p1747_p3 = scmp.ge.s32.totalorder %s2297_s23, 2  ;;  %s1292_s29 = sand.u32 1, %s2269_s16  }
 0x68a   : > { %p3157_p0 = scmp.ne.s32.totalorder %s3118_s13, 0  ;;  %s1293_s22 = scalar_lea.sflag [#allocation9], %s1292_s29 }
 0x68c   : > { %p1741_p10 = pnand %p1747_p3, %p3157_p0 }
 0x68e   : > { %2252 = dma.done.wait (!%p1741_p10), %s1293_s22, 128  }
 0x68f   : > { %2254 = vsyncadd (!%p1741_p10), %s1293_s22, 4294967168  ;;  %s39_s23 = sadd.s32 1, %s2297_s23   ;;  %s3158_s9 = sld [smem:[#allocation33_spill]] }
 0x690   : > { %p36_p5 = scmp.ge.s32.totalorder %s39_s23, 10   ;;  %s3159_s15 = sld [smem:[#allocation41_spill]] }
 0x691   : > { %s3160_s3 = sld [smem:[#allocation34_spill]]  ;;  %s3161_s18 = sld [smem:[#allocation42_spill]] }
 0x692   : > { %s3162_s19 = sld [smem:[#allocation37_spill]]  ;;  %s3163_s20 = sld [smem:[#allocation38_spill]] }
 0x693   : > { %s3164_s21 = sld [smem:[#allocation39_spill]]  ;;  %s3165_s22 = sld [smem:[#allocation40_spill]] }
 0x694   : > { %s3166_s13 = smov %s2261_s14  ;;  %s3168_s16 = smov %s2273_s17 }
 0x695   : > { %s3167_s14 = smov %s3158_s9  ;;  %38 = sbr.rel (!%p36_p5) target bundleno = 30 (0x1e), region = 221 }
 0x697   : > { %s3169_s17 = smov %s3160_s3 }
 0x69c   :  { %1298 = vsyncpa [#allocation8], 1 }
 0x69d   :  { %1300 = vsyncpa [#allocation8 + $0x1], 1 }
 0x69e   :  { %1301 = vsyncpa [#allocation11], 1 }
 0x69f   :  { %1303 = vsyncpa [#allocation11 + $0x1], 1 }
 0x6a0   :  { %1304 = vsyncpa [#allocation14], 1 }
 0x6a1   :  { %1306 = vsyncpa [#allocation14 + $0x1], 1 }
 0x6a2   :  { %1307 = vsyncpa [#allocation17], 1 }
 0x6a3   :  { %1309 = vsyncpa [#allocation17 + $0x1], 1 }
 0x6a4   :  { %1310 = vsyncpa [#allocation20], 1 }
 0x6a5   :  { %1312 = vsyncpa [#allocation20 + $0x1], 1 }
 0x6a6   :  { %1313 = vsyncpa [#allocation23], 1 }
 0x6a7   :  { %1314 = vsyncpa [#allocation9], 1 }
 0x6a8   :  { %1316 = vsyncpa [#allocation9 + $0x1], 1 }

</bundles_post_ra>
